<compile_context>
chip_gen: v6e
topology: v6e:2x2x1
jax: 0.10.0
libtpu: 0.0.40
codegen_flags: <defaults>
</compile_context>

<pallas_src>
import jax
import jax.numpy as jnp
from jax.experimental import pallas as pl
from jax.experimental.pallas import tpu as pltpu

IN_FEATURES = 144
HIDDEN = 144
OUT_FEATURES = 144
TB_CAP = 1024   # batch-tile cap; ~2.5 MiB VMEM at TB=1024 (well inside limits)


def _cdiv(a, b):
    return -(-a // b)


def _round_up(n, m):
    return _cdiv(n, m) * m


def _policy_kernel(x_ref, w1_ref, b1_ref, w2_ref, b2_ref, o_ref):
    # x: [TB, 144] f32; w1/w2: [in, out]=[144,144] bf16 (pre-transposed);
    # b1/b2: [1, 144] f32; o: [TB, 144] f32.
    x = x_ref[...].astype(jnp.bfloat16)

    # fc1: Linear + ReLU (bf16 MXU inputs, f32 accumulation / bias / ReLU)
    h = jnp.dot(x, w1_ref[...], preferred_element_type=jnp.float32) + b1_ref[...]
    h = jnp.maximum(h, 0.0)

    # fc2: Linear
    logits = (jnp.dot(h.astype(jnp.bfloat16), w2_ref[...],
                      preferred_element_type=jnp.float32) + b2_ref[...])

    # Numerically stable softmax over the 144 real lanes (no padding present).
    m = jnp.max(logits, axis=-1, keepdims=True)
    e = jnp.exp(logits - m)
    s = jnp.sum(e, axis=-1, keepdims=True)
    o_ref[...] = (e * pl.reciprocal(s, approx=False)).astype(o_ref.dtype)


def prepare_params(w1, b1, w2, b2):
    """One-time parameter prep (hoisted out of the per-call hot path).

    w*: [out, in] PyTorch layout; b*: [out] or [1, out].
    Returns ([in,out] bf16 weights, [1,out] f32 biases).
    """
    w1t = w1.T.astype(jnp.bfloat16)
    w2t = w2.T.astype(jnp.bfloat16)
    b1p = b1.reshape(1, HIDDEN).astype(jnp.float32)
    b2p = b2.reshape(1, OUT_FEATURES).astype(jnp.float32)
    return w1t, b1p, w2t, b2p


def policy_network_forward(x, w1t, b1p, w2t, b2p):
    """x: [B, 144]; prepped params from prepare_params(). Returns [B, 144] f32."""
    B = x.shape[0]

    # Balanced batch tiling.  >=2 even tiles once the batch is large enough so
    # the "parallel" grid axis shards across both v7x TensorCores.
    n_tiles = max(1, _cdiv(B, TB_CAP))
    if B > 256 and n_tiles < 2:
        n_tiles = 2
    if n_tiles > 1 and n_tiles % 2:
        n_tiles += 1
    TB = _round_up(_cdiv(B, n_tiles), 8)
    Bp = n_tiles * TB

    xp = x.astype(jnp.float32)
    if Bp != B:
        xp = jnp.pad(xp, ((0, Bp - B), (0, 0)))

    out = pl.pallas_call(
        _policy_kernel,
        out_shape=jax.ShapeDtypeStruct((Bp, OUT_FEATURES), jnp.float32),
        grid=(n_tiles,),
        in_specs=[
            pl.BlockSpec((TB, IN_FEATURES), lambda i: (i, 0)),        # x: streamed
            pl.BlockSpec((IN_FEATURES, HIDDEN), lambda i: (0, 0)),    # w1t: resident
            pl.BlockSpec((1, HIDDEN), lambda i: (0, 0)),              # b1
            pl.BlockSpec((HIDDEN, OUT_FEATURES), lambda i: (0, 0)),   # w2t: resident
            pl.BlockSpec((1, OUT_FEATURES), lambda i: (0, 0)),        # b2
        ],
        out_specs=pl.BlockSpec((TB, OUT_FEATURES), lambda i: (i, 0)),
        compiler_params=pltpu.CompilerParams(
            dimension_semantics=("parallel",)),
    )(xp, w1t, b1p, w2t, b2p)

    return out[:B] if Bp != B else out


def init_params(key):
    """Deterministic synthetic parameters; shapes match nn.Linear(144, 144) x2."""
    k1, k2, k3, k4 = jax.random.split(key, 4)
    bound1 = 1.0 / jnp.sqrt(IN_FEATURES)
    bound2 = 1.0 / jnp.sqrt(HIDDEN)
    w1 = jax.random.uniform(k1, (HIDDEN, IN_FEATURES), jnp.float32, -bound1, bound1)
    b1 = jax.random.uniform(k2, (1, HIDDEN), jnp.float32, -bound1, bound1)
    w2 = jax.random.uniform(k3, (OUT_FEATURES, HIDDEN), jnp.float32, -bound2, bound2)
    b2 = jax.random.uniform(k4, (1, OUT_FEATURES), jnp.float32, -bound2, bound2)
    return w1, b1, w2, b2


if __name__ == "__main__":
    key = jax.random.PRNGKey(0)
    k_x, k_p = jax.random.split(key)

    B = 8  # small batch (per-inference-step case)
    x = jax.random.normal(k_x, (B, IN_FEATURES), jnp.float32)
    w1, b1, w2, b2 = init_params(k_p)

    # One-time param prep (transpose + bf16 cast), outside the hot path.
    w1t, b1p, w2t, b2p = prepare_params(w1, b1, w2, b2)

    out = policy_network_forward(x, w1t, b1p, w2t, b2p)
    out = jax.block_until_ready(out)

    # Reference in full f32 (kernel uses bf16 MXU inputs -> loosened tolerance).
    h_ref = jnp.maximum(x @ w1.T + b1, 0.0)
    logits_ref = h_ref @ w2.T + b2
    ref = jax.nn.softmax(logits_ref, axis=-1)

    assert out.shape == (B, OUT_FEATURES)
    assert jnp.allclose(out, ref, atol=5e-3, rtol=5e-2)
    assert jnp.allclose(jnp.sum(out, axis=-1), 1.0, atol=1e-5)

    print("KERNEL_OK")
</pallas_src>

<mosaic_0001>
module attributes {stable_mosaic.version = 11 : i64} {
  func.func @_policy_kernel(%arg0: i32, %arg1: memref<8x144xf32, #tpu.memory_space<vmem>>, %arg2: memref<144x144xbf16, #tpu.memory_space<vmem>>, %arg3: memref<1x144xf32, #tpu.memory_space<vmem>>, %arg4: memref<144x144xbf16, #tpu.memory_space<vmem>>, %arg5: memref<1x144xf32, #tpu.memory_space<vmem>>, %arg6: memref<8x144xf32, #tpu.memory_space<vmem>>) attributes {dimension_semantics = [#tpu.dimension_semantics<parallel>], iteration_bounds = array<i64: 1>, scalar_prefetch = 0 : i64, scratch_operands = 0 : i64, tpu.core_type = #tpu.core_type<tc>, window_params = [{transform_indices = @transform_0, window_bounds = array<i64: 8, 144>}, {pipeline_mode = #tpu.pipeline_mode<synchronous>, transform_indices = @transform_1, window_bounds = array<i64: 144, 144>}, {pipeline_mode = #tpu.pipeline_mode<synchronous>, transform_indices = @transform_2, window_bounds = array<i64: 1, 144>}, {pipeline_mode = #tpu.pipeline_mode<synchronous>, transform_indices = @transform_3, window_bounds = array<i64: 144, 144>}, {pipeline_mode = #tpu.pipeline_mode<synchronous>, transform_indices = @transform_4, window_bounds = array<i64: 1, 144>}, {transform_indices = @transform_5, window_bounds = array<i64: 8, 144>}]} {
    %c0 = arith.constant 0 : index
    %c0_0 = arith.constant 0 : index
    %0 = vector.load %arg1[%c0, %c0_0] : memref<8x144xf32, #tpu.memory_space<vmem>>, vector<8x144xf32>
    %1 = arith.truncf %0 : vector<8x144xf32> to vector<8x144xbf16>
    %c0_1 = arith.constant 0 : index
    %c0_2 = arith.constant 0 : index
    %2 = vector.load %arg2[%c0_1, %c0_2] : memref<144x144xbf16, #tpu.memory_space<vmem>>, vector<144x144xbf16>
    %cst = arith.constant dense<0.000000e+00> : vector<8x144xf32>
    %3 = tpu.matmul %1, %2, %cst {dimension_numbers = #tpu.dot_dimension_numbers<[1], [0], [0], [1], [0, 0, 1, 1], [], []>} : vector<8x144xbf16>, vector<144x144xbf16>, vector<8x144xf32> -> vector<8x144xf32>
    %c0_3 = arith.constant 0 : index
    %c0_4 = arith.constant 0 : index
    %4 = vector.load %arg3[%c0_3, %c0_4] : memref<1x144xf32, #tpu.memory_space<vmem>>, vector<1x144xf32>
    %5 = vector.broadcast %4 : vector<1x144xf32> to vector<8x144xf32>
    %6 = arith.addf %3, %5 : vector<8x144xf32>
    %cst_5 = arith.constant 0.000000e+00 : f32
    %7 = vector.broadcast %cst_5 : f32 to vector<8x144xf32>
    %8 = arith.maximumf %6, %7 : vector<8x144xf32>
    %9 = arith.truncf %8 : vector<8x144xf32> to vector<8x144xbf16>
    %c0_6 = arith.constant 0 : index
    %c0_7 = arith.constant 0 : index
    %10 = vector.load %arg4[%c0_6, %c0_7] : memref<144x144xbf16, #tpu.memory_space<vmem>>, vector<144x144xbf16>
    %cst_8 = arith.constant dense<0.000000e+00> : vector<8x144xf32>
    %11 = tpu.matmul %9, %10, %cst_8 {dimension_numbers = #tpu.dot_dimension_numbers<[1], [0], [0], [1], [0, 0, 1, 1], [], []>} : vector<8x144xbf16>, vector<144x144xbf16>, vector<8x144xf32> -> vector<8x144xf32>
    %c0_9 = arith.constant 0 : index
    %c0_10 = arith.constant 0 : index
    %12 = vector.load %arg5[%c0_9, %c0_10] : memref<1x144xf32, #tpu.memory_space<vmem>>, vector<1x144xf32>
    %13 = vector.broadcast %12 : vector<1x144xf32> to vector<8x144xf32>
    %14 = arith.addf %11, %13 : vector<8x144xf32>
    %cst_11 = arith.constant dense<0xFF800000> : vector<8xf32>
    %15 = vector.multi_reduction <maximumf>, %14, %cst_11 [1] : vector<8x144xf32> to vector<8xf32>
    %16 = vector.shape_cast %15 : vector<8xf32> to vector<8x1xf32>
    %17 = vector.broadcast %16 : vector<8x1xf32> to vector<8x144xf32>
    %18 = arith.subf %14, %17 : vector<8x144xf32>
    %19 = math.exp %18 : vector<8x144xf32>
    %cst_12 = arith.constant dense<0.000000e+00> : vector<8xf32>
    %20 = vector.multi_reduction <add>, %19, %cst_12 [1] : vector<8x144xf32> to vector<8xf32>
    %21 = vector.shape_cast %20 : vector<8xf32> to vector<8x1xf32>
    %22 = tpu.reciprocal %21 : vector<8x1xf32> -> vector<8x1xf32>
    %23 = vector.broadcast %22 : vector<8x1xf32> to vector<8x144xf32>
    %24 = arith.mulf %19, %23 : vector<8x144xf32>
    %c0_13 = arith.constant 0 : index
    %c0_14 = arith.constant 0 : index
    %25 = vector.load %arg6[%c0_13, %c0_14] : memref<8x144xf32, #tpu.memory_space<vmem>>, vector<8x144xf32>
    tpu.vector_store %arg6[%c0_13, %c0_14], %24 {strides = array<i32>} : memref<8x144xf32, #tpu.memory_space<vmem>>, vector<8x144xf32>,
    return
  }
  func.func @transform_0(%arg0: i32) -> (i32, i32) {
    %c0_i32 = arith.constant 0 : i32
    %c0_i32_0 = arith.constant 0 : i32
    return %arg0, %c0_i32 : i32, i32
  }
  func.func @transform_1(%arg0: i32) -> (i32, i32) {
    %c0_i32 = arith.constant 0 : i32
    %c0_i32_0 = arith.constant 0 : i32
    %c0_i32_1 = arith.constant 0 : i32
    return %c0_i32, %c0_i32_0 : i32, i32
  }
  func.func @transform_2(%arg0: i32) -> (i32, i32) {
    %c0_i32 = arith.constant 0 : i32
    %c0_i32_0 = arith.constant 0 : i32
    %c0_i32_1 = arith.constant 0 : i32
    return %c0_i32, %c0_i32_0 : i32, i32
  }
  func.func @transform_3(%arg0: i32) -> (i32, i32) {
    %c0_i32 = arith.constant 0 : i32
    %c0_i32_0 = arith.constant 0 : i32
    %c0_i32_1 = arith.constant 0 : i32
    return %c0_i32, %c0_i32_0 : i32, i32
  }
  func.func @transform_4(%arg0: i32) -> (i32, i32) {
    %c0_i32 = arith.constant 0 : i32
    %c0_i32_0 = arith.constant 0 : i32
    %c0_i32_1 = arith.constant 0 : i32
    return %c0_i32, %c0_i32_0 : i32, i32
  }
  func.func @transform_5(%arg0: i32) -> (i32, i32) {
    %c0_i32 = arith.constant 0 : i32
    %c0_i32_0 = arith.constant 0 : i32
    return %arg0, %c0_i32 : i32, i32
  }
}

</mosaic_0001>

<bundles_post_ra>
// kernel: tpu_custom_call.1
= control target key start
LH: loop header
LB: loop body
LE: loop exit
PB: predicated region body
PF: predicated region fallthrough
CT: control target
= control target key end

     0   :  { %10 = vsyncpa [#allocation3], 0  ;;  %s682_s0 = inlined_call_operand.hbm [shape: f32[8,144], index: 0, kind: input, shape index: {}]   ;;  %s683_s1 = inlined_call_operand.hbm [shape: bf16[144,144], index: 1, kind: input, shape index: {}]   ;;  %s684_s2 = inlined_call_operand.vmem [shape: f32[1,144], index: 2, kind: input, shape index: {}]   ;;  %s685_s3 = inlined_call_operand.hbm [shape: bf16[144,144], index: 3, kind: input, shape index: {}]   ;;  %s686_s4 = inlined_call_operand.vmem [shape: f32[1,144], index: 4, kind: input, shape index: {}]   ;;  %s687_s5 = inlined_call_operand.hbm [shape: f32[8,144], index: 5, kind: output, shape index: {}]  }
   0x1   :  { %11 = vsyncpa [#allocation6], 0 }
   0x2   :  { %12 = vsyncpa [#allocation4], 0  ;;  %s623_s18 = smov [#allocation5]  }
   0x3   :  { %s28_s19 = sshll.u32 %s623_s18, 4  ;;  %s29_s19 = int_to_ptr.vmem [resolvable:$true] %s28_s19 }
   0x4   :  { %s545_s20 = scalar_lea.vmem %s29_s19, 2304  ;;  %p550_p1 = scmp.lt.s32.totalorder %s29_s19, %s29_s19 }
   0x5   :  { %p546_p0 = scmp.ne.s32.totalorder %s29_s19, %s545_s20  ;;  %p551_p2 = scmp.lt.s32.totalorder %s545_s20, %s545_s20 }
   0x7   :  { %p552_p3 = por %p551_p2, %p550_p1 }
   0x9   :  { %p553_p4 = pnand %p552_p3, %p546_p0 }
   0xb   :  { %556 = shalt.err (!%p553_p4)
}
   0xc   :  { %s624_s21 = smov 128   ;;  %s625_s22 = smov 8  }
   0xd   :  { %34 = dma.hbm_to_vmem [thread:$0]  %s683_s1, 2304, %s29_s19, [#allocation6], %s624_s21, %s624_s21, %s625_s22  }
   0xe   :  { %s626_s25 = smov [#allocation2]   ;;  %s627_s27 = smov [#allocation7]  }
   0xf   :  { %s19_s26 = sshll.u32 %s626_s25, 4  ;;  %s42_s28 = sshll.u32 %s627_s27, 4  ;;  %s20_s26 = int_to_ptr.vmem [resolvable:$true] %s19_s26  ;;  %s43_s28 = int_to_ptr.vmem [resolvable:$true] %s42_s28 }
  0x10   :  { %s565_s29 = scalar_lea.vmem %s20_s26, 256  ;;  %p570_p6 = scmp.lt.s32.totalorder %s20_s26, %s20_s26 }
  0x11   :  { %p566_p5 = scmp.ne.s32.totalorder %s20_s26, %s565_s29  ;;  %p571_p7 = scmp.lt.s32.totalorder %s565_s29, %s565_s29 }
  0x13   :  { %p572_p8 = por %p571_p7, %p570_p6 }
  0x15   :  { %p573_p9 = pnand %p572_p8, %p566_p5 }
  0x17   :  { %576 = shalt.err (!%p573_p9)
}
  0x18   :  { %22 = dma.hbm_to_vmem [thread:$0]  %s682_s0, 256, %s20_s26, [#allocation3]  }
  0x19   :  { %s585_s7 = scalar_lea.vmem %s43_s28, 2304  ;;  %p590_p11 = scmp.lt.s32.totalorder %s43_s28, %s43_s28 }
  0x1a   :  { %p586_p10 = scmp.ne.s32.totalorder %s43_s28, %s585_s7  ;;  %p591_p12 = scmp.lt.s32.totalorder %s585_s7, %s585_s7 }
  0x1c   :  { %p592_p13 = por %p591_p12, %p590_p11 }
  0x1e   :  { %p593_p0 = pnand %p592_p13, %p586_p10 }
  0x20   :  { %596 = shalt.err (!%p593_p0)
}
  0x21   :  { %48 = dma.hbm_to_vmem [thread:$0]  %s685_s3, 2304, %s43_s28, [#allocation6], %s624_s21, %s624_s21, %s625_s22  }
  0x22   :  { %617 = dma.done.wait [#allocation3], 256  }
  0x23   :  { %618 = vsyncadd [#allocation3], 4294967040 }
  0x24   :  { %619 = dma.done.wait [#allocation6], 4608  }
  0x25   :  { %620 = vsyncadd [#allocation6], 4294962688  ;;  %v477_v0 = vld [vmem:[#allocation5 + $0x74] ss:$8 sps:$4 sm:$0xff]   ;;  %v479_v1 = vld [vmem:[#allocation5 + $0x70] ss:$8 sps:$4 sm:$0xff]   ;;  %v85_v40 = vlaneseq }
  0x26   :  { %189 = vmatprep.subr.bf16.mxu0 %v477_v0  ;;  %v480_v2 = vld [vmem:[#allocation5 + $0x64] ss:$8 sps:$4 sm:$0xff]   ;;  %v482_v3 = vld [vmem:[#allocation5 + $0x60] ss:$8 sps:$4 sm:$0xff]   ;;  %v483_v4 = vld [vmem:[#allocation5 + $0x54] ss:$8 sps:$4 sm:$0xff]  }
  0x27   :  { %190 = vmatpush1.bf16.msra.mxu0 %v479_v1  ;;  %v485_v5 = vld [vmem:[#allocation5 + $0x50] ss:$8 sps:$4 sm:$0xff]   ;;  %v486_v6 = vld [vmem:[#allocation5 + $0x44] ss:$8 sps:$4 sm:$0xff]   ;;  %v488_v7 = vld [vmem:[#allocation5 + $0x40] ss:$8 sps:$4 sm:$0xff]  }
  0x28   :  { %191 = vmatprep.subr.bf16.mxu0 %v480_v2  ;;  %v489_v8 = vld [vmem:[#allocation5 + $0x34] ss:$8 sps:$4 sm:$0xff]   ;;  %vm185_vm0 = vcmask 130048   ;;  %v504_v11 = vld [vmem:[#allocation7 + $0x74] ss:$8 sps:$4 sm:$0xff]   ;;  %v86_v41 = vshrl.u32 %v85_v40, 7 }
  0x29   :  { %v62_v9 = vld [vmem:[#allocation2 + $0x8] sm:$0xff]  ;;  %v506_v12 = vld [vmem:[#allocation7 + $0x70] ss:$8 sps:$4 sm:$0xff]   ;;  %v492_v15 = vld [vmem:[#allocation5 + $0x24] ss:$8 sps:$4 sm:$0xff]   ;;  %357 = vmatprep.subr.bf16.mxu1 %v504_v11 }
  0x2a   :  { %v64_v10 = vpack.c.bf16 %v62_v9, %v62_v9  ;;  %v507_v13 = vld [vmem:[#allocation7 + $0x64] ss:$8 sps:$4 sm:$0xff]   ;;  %v491_v14 = vld [vmem:[#allocation5 + $0x30] ss:$8 sps:$4 sm:$0xff]   ;;  %358 = vmatpush1.bf16.msra.mxu1 %v506_v12  ;;  %v510_v17 = vld [vmem:[#allocation7 + $0x54] ss:$8 sps:$4 sm:$0xff]  }
  0x2b   :  { %192 = vmatpush1.bf16.msra.mxu0 %v482_v3  ;;  %v509_v16 = vld [vmem:[#allocation7 + $0x60] ss:$8 sps:$4 sm:$0xff]   ;;  %359 = vmatprep.subr.bf16.mxu1 %v507_v13  ;;  %v494_v18 = vld [vmem:[#allocation5 + $0x20] ss:$8 sps:$4 sm:$0xff]   ;;  %v495_v19 = vld [vmem:[#allocation5 + $0x14] ss:$8 sps:$4 sm:$0xff]  }
  0x2c   :  { %193 = vmatprep.subr.bf16.mxu0 %v483_v4  ;;  %451 = vmatprep.mubr.msk.bf16.mxu0 %vm185_vm0, %v64_v10  ;;  %v512_v20 = vld [vmem:[#allocation7 + $0x50] ss:$8 sps:$4 sm:$0xff]   ;;  %v513_v21 = vld [vmem:[#allocation7 + $0x44] ss:$8 sps:$4 sm:$0xff]   ;;  %v497_v22 = vld [vmem:[#allocation5 + $0x10] ss:$8 sps:$4 sm:$0xff]  }
  0x2d   :  { %v498_v23 = vld [vmem:[#allocation5 + $0x4] ss:$8 sps:$4 sm:$0xff]   ;;  %v515_v24 = vld [vmem:[#allocation7 + $0x40] ss:$8 sps:$4 sm:$0xff]   ;;  %v500_v26 = vld [vmem:[#allocation5] ss:$8 sps:$4 sm:$0xff]  }
  0x2e   :  { %360 = vmatpush1.bf16.msra.mxu1 %v509_v16  ;;  %v516_v25 = vld [vmem:[#allocation7 + $0x34] ss:$8 sps:$4 sm:$0xff]   ;;  %v518_v28 = vld [vmem:[#allocation7 + $0x30] ss:$8 sps:$4 sm:$0xff]   ;;  %v519_v29 = vld [vmem:[#allocation7 + $0x24] ss:$8 sps:$4 sm:$0xff]  }
  0x2f   :  { %194 = vmatpush1.bf16.msra.mxu0 %v485_v5  ;;  %361 = vmatprep.subr.bf16.mxu1 %v510_v17  ;;  %v501_v27 = vld [vmem:[#allocation5 + $0x84] ss:$8 sps:$4 sm:$0xff]   ;;  %v503_v30 = vld [vmem:[#allocation5 + $0x80] ss:$8 sps:$4 sm:$0xff]   ;;  %v61_v31 = vld [vmem:[#allocation2] sm:$0xff]  ;;  %v87_v42 = vsub.s32 0, %v86_v41 }
  0x30   :  { %195 = vmatprep.subr.bf16.mxu0 %v486_v6  ;;  %v521_v32 = vld [vmem:[#allocation7 + $0x20] ss:$8 sps:$4 sm:$0xff]   ;;  %v63_v33 = vpack.c.bf16 %v61_v31, %v61_v31  ;;  %v522_v34 = vld [vmem:[#allocation7 + $0x14] ss:$8 sps:$4 sm:$0xff]   ;;  %v524_v35 = vld [vmem:[#allocation7 + $0x10] ss:$8 sps:$4 sm:$0xff]  }
  0x31   :  { %v525_v36 = vld [vmem:[#allocation7 + $0x4] ss:$8 sps:$4 sm:$0xff]   ;;  %v527_v37 = vld [vmem:[#allocation7] ss:$8 sps:$4 sm:$0xff]   ;;  %v91_v44 = vsub.s32 1, %v86_v41 }
  0x32   :  { %362 = vmatpush1.bf16.msra.mxu1 %v512_v20  ;;  %v528_v38 = vld [vmem:[#allocation7 + $0x84] ss:$8 sps:$4 sm:$0xff]   ;;  %v530_v39 = vld [vmem:[#allocation7 + $0x80] ss:$8 sps:$4 sm:$0xff]  }
  0x33   :  { %196 = vmatpush1.bf16.msra.mxu0 %v488_v7  ;;  %363 = vmatprep.subr.bf16.mxu1 %v513_v21  ;;  %v83_v43 = vld [vmem:[%s684_s2] sm:$0x3]  ;;  %s628_s2 = smov [#allocation8]  }
  0x34   :  { %197 = vmatprep.subr.bf16.mxu0 %v489_v8  ;;  %v88_v45 = vrot.slane %v83_v43, %v87_v42  ;;  %v92_v46 = vrot.slane %v83_v43, %v91_v44  ;;  %v252_v57 = vld [vmem:[%s686_s4] sm:$0x3]  ;;  %s423_s4 = sshll.u32 %s628_s2, 4  ;;  %s424_s4 = int_to_ptr.vmem [resolvable:$true] %s423_s4 }
  0x35   :  { %v261_v58 = vrot.slane %v252_v57, %v91_v44  ;;  %v257_v59 = vrot.slane %v252_v57, %v87_v42  ;;  %s597_s11 = scalar_lea.vmem %s424_s4, 256  ;;  %p602_p2 = scmp.lt.s32.totalorder %s424_s4, %s424_s4 }
  0x36   :  { %364 = vmatpush1.bf16.msra.mxu1 %v515_v24  ;;  %p598_p1 = scmp.ne.s32.totalorder %s424_s4, %s597_s11  ;;  %p603_p3 = scmp.lt.s32.totalorder %s597_s11, %s597_s11 }
  0x37   :  { %198 = vmatpush1.bf16.msra.mxu0 %v491_v14  ;;  %365 = vmatprep.subr.bf16.mxu1 %v516_v25 }
  0x38   :  { %199 = vmatprep.subr.bf16.mxu0 %v492_v15  ;;  %p604_p4 = por %p603_p3, %p602_p2 }
  0x3a   :  { %366 = vmatpush1.bf16.msra.mxu1 %v518_v28  ;;  %p605_p5 = pnand %p604_p4, %p598_p1 }
  0x3b   :  { %200 = vmatpush1.bf16.msra.mxu0 %v494_v18  ;;  %367 = vmatprep.subr.bf16.mxu1 %v519_v29 }
  0x3c   :  { %201 = vmatprep.subr.bf16.mxu0 %v495_v19 }
  0x3e   :  { %368 = vmatpush1.bf16.msra.mxu1 %v521_v32 }
  0x3f   :  { %202 = vmatpush1.bf16.msra.mxu0 %v497_v22  ;;  %369 = vmatprep.subr.bf16.mxu1 %v522_v34 }
  0x40   :  { %203 = vmatprep.subr.bf16.mxu0 %v498_v23 }
  0x42   :  { %370 = vmatpush1.bf16.msra.mxu1 %v524_v35 }
  0x43   :  { %204 = vmatpush1.bf16.msra.mxu0 %v500_v26  ;;  %371 = vmatprep.subr.bf16.mxu1 %v525_v36 }
  0x44   :  { %219 = vmatprep.subr.bf16.mxu0 %v501_v27 }
  0x46   :  { %372 = vmatpush1.bf16.msra.mxu1 %v527_v37 }
  0x47   :  { %220 = vmatpush2.bf16.msra.mxu0 %v503_v30  ;;  %387 = vmatprep.subr.bf16.mxu1 %v528_v38 }
  0x4a   :  { %222 = vmatmul.mubr.bf16.vlgmr.msra.gmra.mxu0 %v63_v33  ;;  %388 = vmatpush2.bf16.msra.mxu1 %v530_v39 }
 0x10a   :  { %v223_v47 = vpop.f32.mrf.mxu0 }
 0x10b   :  { %v224_v48 = vadd.f32 %v223_v47, %v88_v45 }
 0x10c   :  { %v225_v49 = vpop.f32.mrf.mxu0 }
 0x10d   :  { %v226_v50 = vadd.f32 %v225_v49, %v92_v46  ;;  %v230_v51 = vmax.f32 %v224_v48, 0.0 }
 0x10e   :  { %v227_v52 = vpop.f32.mrf.mxu0 }
 0x10f   :  { %v231_v53 = vmax.f32 %v226_v50, 0.0  ;;  %v232_v56 = vpack.c.bf16 %v230_v51, %v230_v51 }
 0x110   :  { %v228_v54 = vpop.f32.mrf.mxu0 }
 0x111   :  { %v233_v55 = vpack.c.bf16 %v231_v53, %v231_v53 }
 0x113   :  { %470 = vmatprep.mubr.msk.bf16.mxu1 %vm185_vm0, %v233_v55 }
 0x114   :  { %390 = vmatmul.mubr.bf16.vlgmr.msra.gmra.mxu1 %v232_v56 }
 0x1d4   :  { %v391_v60 = vpop.f32.mrf.mxu1 }
 0x1d5   :  { %v392_v63 = vadd.f32 %v391_v60, %v257_v59 }
 0x1d6   :  { %v393_v61 = vpop.f32.mrf.mxu1 }
 0x1d7   :  { %v394_v62 = vadd.f32 %v393_v61, %v261_v58 }
 0x1d8   :  { %v395_v0 = vpop.f32.mrf.mxu1 }
 0x1d9   :  { %v398_v1 = vsel %vm185_vm0, %v394_v62, -inf }
 0x1da   :  { %v396_v2 = vpop.f32.mrf.mxu1  ;;  %v399_v3 = vmax.f32 %v392_v63, %v398_v1 }
 0x1dc   :  { %400 = vmax.xlane.f32.xlu0 %v399_v3 }
 0x265   :  { %v401_v4 = vpop.xlane.xlu0 %400 }
 0x266   :  { %v402_v5 = vsub.f32 %v392_v63, %v401_v4  ;;  %v403_v6 = vsub.f32 %v394_v62, %v401_v4 }
 0x268   :  { %v404_v7 = vmul.f32 1.442695, %v402_v5  ;;  %v406_v8 = vmul.f32 1.442695, %v403_v6 }
 0x26a   :  { %531 = vpow2.f32 %v404_v7 }
 0x26b   :  { %533 = vpow2.f32 %v406_v8 }
 0x277   :  { %v532_v9 = vpop.eup %531 }
 0x278   :  { %v534_v10 = vpop.eup %533 }
 0x279   :  { %v408_v11 = vsel %vm185_vm0, %v534_v10, 0.0 }
 0x27a   :  { %v409_v12 = vadd.f32 %v532_v9, %v408_v11 }
 0x27c   :  { %410 = vadd.xlane.f32.xlu0 %v409_v12 }
 0x305   :  { %v411_v13 = vpop.xlane.xlu0 %410 }
 0x306   :  { %535 = vrcp.f32 %v411_v13 }
 0x313   :  { %v536_v14 = vpop.eup %535 }
 0x314   :  { %v413_v15 = vmul.f32 %v536_v14, %v532_v9  ;;  %v414_v16 = vmul.f32 %v536_v14, %v534_v10 }
 0x316   :  { %415 = vst [vmem:[#allocation8] sm:$0xff] %v413_v15  ;;  %416 = vst.msk [vmem:[#allocation8 + $0x8] sm:$0xff] %vm185_vm0, %v414_v16 }
 0x317   :  { %608 = shalt.err (!%p605_p5)
}
 0x318   :  { %426 = dma.vmem_to_hbm [thread:$0]  %s424_s4, 256, %s687_s5, [#allocation4]  }
 0x319   :  { %621 = dma.done.wait [#allocation4], 256  }
 0x31a   :  { %622 = vsyncadd [#allocation4], 4294967040 }
 0x31b   :  { %430 = vsyncpa [#allocation3], 1 }
 0x31c   :  { %431 = vsyncpa [#allocation6], 1 }
 0x31d   :  { %432 = vsyncpa [#allocation4], 1 }

</bundles_post_ra>
